<compile_context>
chip_gen: v5e
topology: v5e:2x2
jax: 0.10.0
libtpu: 0.0.40
codegen_flags: <defaults>
</compile_context>

<pallas_src>
import jax
import jax.numpy as jnp
from jax.experimental import pallas as pl
from jax.experimental.pallas import tpu as pltpu


def _round_up(x, m):
    return (x + m - 1) // m * m


def _lr_kernel(x_ref, wt_ref, b_ref, o_ref):
    # x tile: (TB, F); wt: (F, C) resident across the grid; b: (1, C).
    x = x_ref[...].astype(jnp.float32)            # matches x.float() in PyTorch
    y = jnp.dot(x, wt_ref[...],
                preferred_element_type=jnp.float32,
                precision=jax.lax.Precision.HIGHEST)
    o_ref[...] = y + b_ref[...]                   # (TB, C) store, no lane padding
    # TODO(synk): if a sigmoid/softmax/argmax epilogue follows in the real
    # model, fuse it here so logits never round-trip HBM.


def prepare_params(weight, bias):
    """One-time parameter setup (NOT on the per-call path).

    weight: (C, F), bias: (C,)  ->  wt: (F, C) f32, b: (1, C) f32
    """
    C, F = weight.shape
    wt = weight.T.astype(jnp.float32)             # (F, C)
    b = bias.astype(jnp.float32).reshape(1, C)    # (1, C)
    return wt, b


def lr_forward(x, wt, b, *, block_b=2048):
    """x: (B, F) float/bf16; wt/b from prepare_params. Returns (B, C) f32 logits."""
    B, F = x.shape
    Fw, C = wt.shape
    assert Fw == F

    # Batch tile: small batches run as a single (8-aligned) tile; large batches
    # are tiled at `block_b` rows so x / out are double-buffered over the grid.
    tb = min(_round_up(B, 8), block_b)
    grid = (pl.cdiv(B, tb),)

    cost = pl.CostEstimate(
        flops=2 * B * F * C,
        transcendentals=0,
        bytes_accessed=B * F * x.dtype.itemsize + F * C * 4 + C * 4 + B * C * 4,
    )

    y = pl.pallas_call(
        _lr_kernel,
        out_shape=jax.ShapeDtypeStruct((B, C), jnp.float32),
        grid_spec=pltpu.PrefetchScalarGridSpec(
            num_scalar_prefetch=0,
            grid=grid,
            in_specs=[
                pl.BlockSpec((tb, F), lambda i: (i, 0)),   # x tile per step
                pl.BlockSpec((F, C), lambda i: (0, 0)),    # W resident
                pl.BlockSpec((1, C), lambda i: (0, 0)),    # bias resident
            ],
            out_specs=pl.BlockSpec((tb, C), lambda i: (i, 0)),
        ),
        compiler_params=pltpu.CompilerParams(
            # Batch tiles are independent -> shard across TCs where available.
            dimension_semantics=("parallel",),
        ),
        cost_estimate=cost,
    )(x, wt, b)

    return y


if __name__ == "__main__":
    n_features, n_classes = 60, 10
    batch = 8

    key = jax.random.PRNGKey(0)
    kx, kw, kb = jax.random.split(key, 3)

    # Deterministic parameter init (mimics nn.Linear's U(-1/sqrt(F), 1/sqrt(F))).
    bound = 1.0 / jnp.sqrt(jnp.float32(n_features))
    weight = jax.random.uniform(kw, (n_classes, n_features), jnp.float32,
                                minval=-bound, maxval=bound)
    bias = jax.random.uniform(kb, (n_classes,), jnp.float32,
                              minval=-bound, maxval=bound)

    x = jax.random.normal(kx, (batch, n_features), dtype=jnp.float32)

    # One-time setup (outside the per-call path).
    wt, b = prepare_params(weight, bias)

    y = lr_forward(x, wt, b)
    y = jax.block_until_ready(y)

    # Reference check (plain JAX) for correctness.
    y_ref = x.astype(jnp.float32) @ weight.T + bias
    assert y.shape == (batch, n_classes)
    assert jnp.allclose(y, y_ref, atol=1e-5, rtol=1e-5)

    print("KERNEL_OK")
</pallas_src>

<mosaic_0001>
module attributes {stable_mosaic.version = 11 : i64} {
  func.func @_lr_kernel(%arg0: i32, %arg1: memref<8x60xf32, #tpu.memory_space<vmem>>, %arg2: memref<60x10xf32, #tpu.memory_space<vmem>>, %arg3: memref<1x10xf32, #tpu.memory_space<vmem>>, %arg4: memref<8x10xf32, #tpu.memory_space<vmem>>) attributes {dimension_semantics = [#tpu.dimension_semantics<parallel>], iteration_bounds = array<i64: 1>, scalar_prefetch = 0 : i64, scratch_operands = 0 : i64, tpu.core_type = #tpu.core_type<tc>, window_params = [{transform_indices = @transform_0, window_bounds = array<i64: 8, 60>}, {pipeline_mode = #tpu.pipeline_mode<synchronous>, transform_indices = @transform_1, window_bounds = array<i64: 60, 10>}, {pipeline_mode = #tpu.pipeline_mode<synchronous>, transform_indices = @transform_2, window_bounds = array<i64: 1, 10>}, {transform_indices = @transform_3, window_bounds = array<i64: 8, 10>}]} {
    %c0 = arith.constant 0 : index
    %c0_0 = arith.constant 0 : index
    %0 = vector.load %arg1[%c0, %c0_0] : memref<8x60xf32, #tpu.memory_space<vmem>>, vector<8x60xf32>
    %c0_1 = arith.constant 0 : index
    %c0_2 = arith.constant 0 : index
    %1 = vector.load %arg2[%c0_1, %c0_2] : memref<60x10xf32, #tpu.memory_space<vmem>>, vector<60x10xf32>
    %cst = arith.constant dense<0.000000e+00> : vector<8x10xf32>
    %2 = tpu.matmul %0, %1, %cst {dimension_numbers = #tpu.dot_dimension_numbers<[1], [0], [0], [1], [0, 0, 1, 1], [], []>, precision = #tpu.contract_precision<fp32>} : vector<8x60xf32>, vector<60x10xf32>, vector<8x10xf32> -> vector<8x10xf32>
    %c0_3 = arith.constant 0 : index
    %c0_4 = arith.constant 0 : index
    %3 = vector.load %arg3[%c0_3, %c0_4] : memref<1x10xf32, #tpu.memory_space<vmem>>, vector<1x10xf32>
    %4 = vector.broadcast %3 : vector<1x10xf32> to vector<8x10xf32>
    %5 = arith.addf %2, %4 : vector<8x10xf32>
    %c0_5 = arith.constant 0 : index
    %c0_6 = arith.constant 0 : index
    %6 = vector.load %arg4[%c0_5, %c0_6] : memref<8x10xf32, #tpu.memory_space<vmem>>, vector<8x10xf32>
    tpu.vector_store %arg4[%c0_5, %c0_6], %5 {strides = array<i32>} : memref<8x10xf32, #tpu.memory_space<vmem>>, vector<8x10xf32>,
    return
  }
  func.func @transform_0(%arg0: i32) -> (i32, i32) {
    %c0_i32 = arith.constant 0 : i32
    %c0_i32_0 = arith.constant 0 : i32
    return %arg0, %c0_i32 : i32, i32
  }
  func.func @transform_1(%arg0: i32) -> (i32, i32) {
    %c0_i32 = arith.constant 0 : i32
    %c0_i32_0 = arith.constant 0 : i32
    %c0_i32_1 = arith.constant 0 : i32
    return %c0_i32, %c0_i32_0 : i32, i32
  }
  func.func @transform_2(%arg0: i32) -> (i32, i32) {
    %c0_i32 = arith.constant 0 : i32
    %c0_i32_0 = arith.constant 0 : i32
    %c0_i32_1 = arith.constant 0 : i32
    return %c0_i32, %c0_i32_0 : i32, i32
  }
  func.func @transform_3(%arg0: i32) -> (i32, i32) {
    %c0_i32 = arith.constant 0 : i32
    %c0_i32_0 = arith.constant 0 : i32
    return %arg0, %c0_i32 : i32, i32
  }
}

</mosaic_0001>

<bundles_post_ra>
// kernel: tpu_custom_call.1
= control target key start
LH: loop header
LB: loop body
LE: loop exit
PB: predicated region body
PF: predicated region fallthrough
CT: control target
= control target key end

     0   :  { %vm32_vm0 = vcmask 1043456   ;;  %vm28_vm1 = vcmask 490496   ;;  %s451_s0 = inlined_call_operand.vmem [shape: f32[8,60], index: 0, kind: input, shape index: {}]   ;;  %s452_s1 = inlined_call_operand.vmem [shape: f32[60,10], index: 1, kind: input, shape index: {}]   ;;  %s453_s2 = inlined_call_operand.vmem [shape: f32[1,10], index: 2, kind: input, shape index: {}]   ;;  %s454_s3 = inlined_call_operand.hbm [shape: f32[8,10], index: 3, kind: output, shape index: {}]  }
   0x1   :  { %v23_v0 = vld [vmem:[%s452_s1 + $0x38] sm:$0xf]  ;;  %v22_v1 = vld [vmem:[%s452_s1 + $0x30] sm:$0xff]  ;;  %v21_v2 = vld [vmem:[%s452_s1 + $0x28] sm:$0xff] }
   0x2   :  { %v34_v3 = vsel %vm32_vm0, %v23_v0, 0  ;;  %v349_v4 = vand.u32 4294901760, %v22_v1  ;;  %v351_v5 = vand.u32 4294901760, %v21_v2  ;;  %v20_v6 = vld [vmem:[%s452_s1 + $0x20] sm:$0xff]  ;;  %v19_v7 = vld [vmem:[%s452_s1 + $0x18] sm:$0xff]  ;;  %v18_v8 = vld [vmem:[%s452_s1 + $0x10] sm:$0xff] }
   0x3   :  { %v362_v9 = vand.u32 4294901760, %v34_v3  ;;  %v364_v10 = vand.u32 4294901760, %v20_v6  ;;  %v366_v11 = vand.u32 4294901760, %v19_v7  ;;  %v368_v12 = vand.u32 4294901760, %v18_v8  ;;  %v17_v13 = vld [vmem:[%s452_s1 + $0x8] sm:$0xff]  ;;  %v16_v14 = vld [vmem:[%s452_s1] sm:$0xff] }
   0x4   :  { %v377_v15 = vsub.f32 %v22_v1, %v349_v4  ;;  %v380_v16 = vsub.f32 %v21_v2, %v351_v5  ;;  %v391_v20 = vand.u32 4294901760, %v17_v13  ;;  %v15_v21 = vld [vmem:[%s451_s0] sm:$0xff] }
   0x5   :  { %45 = vmatpush.msra.mxu0 %v362_v9  ;;  %v78_v17 = vsub.f32 %v34_v3, %v362_v9  ;;  %177 = vmatpush.msra.mxu3 %v362_v9  ;;  %v386_v18 = vsub.f32 %v20_v6, %v364_v10  ;;  %v389_v19 = vsub.f32 %v19_v7, %v366_v11 }
   0x6   :  { %8 = vsyncpa [#allocation3], 0  ;;  %v85_v22 = vand.u32 4294901760, %v377_v15  ;;  %v91_v23 = vand.u32 4294901760, %v380_v16  ;;  %v398_v24 = vand.u32 4294901760, %v16_v14  ;;  %v403_v27 = vsub.f32 %v18_v8, %v368_v12  ;;  %s319_s30 = smov [#allocation2]  }
   0x7   :  { %47 = vmatpush.msra.mxu0 %v349_v4  ;;  %v79_v25 = vand.u32 4294901760, %v78_v17  ;;  %140 = vmatpush.msra.mxu2 %v78_v17  ;;  %v97_v26 = vand.u32 4294901760, %v386_v18  ;;  %v30_v29 = vsel %vm28_vm1, %v15_v21, 0  ;;  %v103_v32 = vand.u32 4294901760, %v389_v19  ;;  %v292_v56 = vld [vmem:[%s453_s2] ss:$0 sm:$0xff] }
   0x8   :  { %v86_v28 = vsub.f32 %v377_v15, %v85_v22  ;;  %179 = vmatpush.msra.mxu3 %v349_v4  ;;  %v92_v31 = vsub.f32 %v380_v16, %v91_v23  ;;  %v114_v33 = vsub.f32 %v17_v13, %v391_v20  ;;  %v120_v34 = vsub.f32 %v16_v14, %v398_v24  ;;  %s280_s4 = sshll.u32 %s319_s30, 4  ;;  %s282_s7 = sshll.u32 %s454_s3, 4  ;;  %s281_s4 = int_to_ptr.vmem [resolvable:$true] %s280_s4  ;;  %s283_s7 = int_to_ptr.hbm [resolvable:$true] %s282_s7 }
   0x9   :  { %v80_v30 = vsub.f32 %v78_v17, %v79_v25  ;;  %49 = vmatpush.msra.mxu0 %v351_v5  ;;  %143 = vmatpush.msra.mxu2 %v377_v15  ;;  %v98_v37 = vsub.f32 %v386_v18, %v97_v26  ;;  %v109_v38 = vand.u32 4294901760, %v403_v27  ;;  %v60_v39 = vand.u32 4294901760, %v30_v29 }
   0xa   :  { %181 = vmatpush.msra.mxu3 %v351_v5  ;;  %v87_v36 = vand.u32 4294901760, %v86_v28  ;;  %v93_v40 = vand.u32 4294901760, %v92_v31  ;;  %v104_v41 = vsub.f32 %v389_v19, %v103_v32  ;;  %v115_v42 = vand.u32 4294901760, %v114_v33 }
   0xb   :  { %v81_v35 = vand.u32 4294901760, %v80_v30  ;;  %51 = vmatpush.msra.mxu0 %v364_v10  ;;  %146 = vmatpush.msra.mxu2 %v380_v16  ;;  %v61_v43 = vsub.f32 %v30_v29, %v60_v39  ;;  %v99_v44 = vand.u32 4294901760, %v98_v37  ;;  %v110_v45 = vsub.f32 %v403_v27, %v109_v38 }
   0xc   :  { %183 = vmatpush.msra.mxu3 %v364_v10  ;;  %v121_v46 = vand.u32 4294901760, %v120_v34  ;;  %v105_v48 = vand.u32 4294901760, %v104_v41  ;;  %v116_v49 = vsub.f32 %v114_v33, %v115_v42  ;;  %vm273_vm2 = vcmask 80896  }
   0xd   :  { %82 = vmatpush.msra.mxu1 %v81_v35  ;;  %53 = vmatpush.msra.mxu0 %v366_v11  ;;  %v62_v47 = vand.u32 4294901760, %v61_v43  ;;  %v111_v51 = vand.u32 4294901760, %v110_v45 }
   0xe   :  { %149 = vmatpush.msra.mxu2 %v386_v18  ;;  %185 = vmatpush.msra.mxu3 %v366_v11  ;;  %v122_v52 = vsub.f32 %v120_v34, %v121_v46  ;;  %v117_v53 = vand.u32 4294901760, %v116_v49 }
   0xf   :  { %88 = vmatpush.msra.mxu1 %v87_v36  ;;  %55 = vmatpush.msra.mxu0 %v368_v12  ;;  %v63_v50 = vsub.f32 %v61_v43, %v62_v47 }
  0x10   :  { %152 = vmatpush.msra.mxu2 %v389_v19  ;;  %187 = vmatpush.msra.mxu3 %v368_v12  ;;  %v123_v55 = vand.u32 4294901760, %v122_v52 }
  0x11   :  { %94 = vmatpush.msra.mxu1 %v93_v40  ;;  %57 = vmatpush.msra.mxu0 %v391_v20  ;;  %v64_v54 = vand.u32 4294901760, %v63_v50 }
  0x12   :  { %155 = vmatpush.msra.mxu2 %v403_v27  ;;  %189 = vmatpush.msra.mxu3 %v391_v20 }
  0x13   :  { %100 = vmatpush.msra.mxu1 %v99_v44  ;;  %59 = vmatpush.msra.mxu0 %v398_v24 }
  0x14   :  { %158 = vmatpush.msra.mxu2 %v114_v33  ;;  %191 = vmatpush.msra.mxu3 %v398_v24 }
  0x15   :  { %210 = vmatpush.msrb.mxu0 %v79_v25  ;;  %106 = vmatpush.msra.mxu1 %v105_v48 }
  0x16   :  { %161 = vmatpush.msra.mxu2 %v120_v34  ;;  %195 = vmatmul.f32.vlgmr.msra.gmra.mxu3 %v62_v47 }
  0x17   :  { %214 = vmatpush.msrb.mxu0 %v85_v22  ;;  %112 = vmatpush.msra.mxu1 %v111_v51 }
  0x18   :  { %164 = vmatmul.f32.vlgmr.msra.gmra.mxu2 %v61_v43  ;;  %65 = vmatmul.f32.vlgmr.msra.gmra.mxu0 %v64_v54 }
  0x19   :  { %218 = vmatpush.msrb.mxu0 %v91_v23  ;;  %118 = vmatpush.msra.mxu1 %v117_v53 }
  0x1b   :  { %222 = vmatpush.msrb.mxu0 %v97_v26  ;;  %124 = vmatpush.msra.mxu1 %v123_v55 }
  0x1c   :  { %126 = vmatmul.f32.vlgmr.msra.gmra.mxu1 %v60_v39 }
  0x1d   :  { %253 = vmatpush.msrb.mxu1 %v362_v9  ;;  %226 = vmatpush.msrb.mxu0 %v103_v32 }
  0x1f   :  { %255 = vmatpush.msrb.mxu1 %v349_v4  ;;  %230 = vmatpush.msrb.mxu0 %v109_v38 }
  0x21   :  { %257 = vmatpush.msrb.mxu1 %v351_v5  ;;  %234 = vmatpush.msrb.mxu0 %v115_v42 }
  0x23   :  { %259 = vmatpush.msrb.mxu1 %v364_v10  ;;  %238 = vmatpush.msrb.mxu0 %v121_v46 }
  0x24   :  { %240 = vmatmul.f32.vlgmr.msrb.gmra.mxu0 %v60_v39 }
  0x25   :  { %261 = vmatpush.msrb.mxu1 %v366_v11 }
  0x27   :  { %263 = vmatpush.msrb.mxu1 %v368_v12 }
  0x29   :  { %265 = vmatpush.msrb.mxu1 %v391_v20 }
  0x2b   :  { %267 = vmatpush.msrb.mxu1 %v398_v24 }
  0x2c   :  { %269 = vmatmul.f32.vlgmr.msrb.gmra.mxu1 %v60_v39 }
  0x95   :  { %v66_v57 = vpop.f32.mrf.mxu0 }
  0x96   :  { %v67_v58 = vadd.f32 %v292_v56, %v66_v57 }
  0x99   :  { %v127_v59 = vpop.f32.mrf.mxu1  ;;  %v196_v63 = vpop.f32.mrf.mxu3 }
  0x9a   :  { %v128_v61 = vadd.f32 %v127_v59, %v67_v58 }
  0x9b   :  { %v165_v60 = vpop.f32.mrf.mxu2 }
  0x9c   :  { %v166_v62 = vadd.f32 %v165_v60, %v128_v61 }
  0x9e   :  { %v197_v0 = vadd.f32 %v196_v63, %v166_v62 }
  0xa1   :  { %v241_v1 = vpop.f32.mrf.mxu0 }
  0xa2   :  { %v242_v2 = vadd.f32 %v241_v1, %v197_v0 }
  0xa9   :  { %v270_v3 = vpop.f32.mrf.mxu1 }
  0xaa   :  { %v271_v4 = vadd.f32 %v270_v3, %v242_v2 }
  0xac   :  { %274 = vst.msk [vmem:[#allocation2] sm:$0xff] %vm273_vm2, %v271_v4 }
  0xad   :  { %285 = dma.vmem_to_hbm [thread:$0]  %s281_s4, 128, %s283_s7, [#allocation3]  }
  0xae   :  { %317 = dma.done.wait [#allocation3], 128  }
  0xaf   :  { %318 = vsyncadd [#allocation3], 4294967168 }
  0xb0   :  { %290 = vsyncpa [#allocation3], 1 }

</bundles_post_ra>
